<compile_context>
chip_gen: v5e
topology: v5e:2x2
jax: 0.10.0
libtpu: 0.0.40
codegen_flags: <defaults>
</compile_context>

<pallas_src>
import jax
import jax.numpy as jnp
from jax.experimental import pallas as pl
from jax.experimental.pallas import tpu as pltpu


# --------------------------------------------------------------------------------------
# forward: per-row embedding gather (scalar-prefetch indices) + dot + sigmoid
# --------------------------------------------------------------------------------------
def bpr_forward_kernel(users_sref, items_sref, u_row_ref, i_row_ref, o_ref):
    """One grid step == one batch element.

    u_row_ref / i_row_ref : (1, 1, D) embedding rows DMA-gathered by the index_maps.
    o_ref                 : (1, B) score slab, resident across the whole grid
                            (same output block every step -> "arbitrary" axis).
    """
    del users_sref, items_sref                      # consumed by the index_maps only
    i = pl.program_id(0)

    @pl.when(i == 0)
    def _():
        o_ref[...] = jnp.zeros_like(o_ref)

    prod = u_row_ref[...].astype(jnp.float32) * i_row_ref[...].astype(jnp.float32)
    score = jax.nn.sigmoid(jnp.sum(prod))                        # scalar
    lane = jax.lax.broadcasted_iota(jnp.int32, o_ref.shape, 1)   # (1, B)
    # Full-width select + store into the lane-dense score slab.
    o_ref[...] = jnp.where(lane == i, score, o_ref[...])


def bpr_forward(users, items, user_table, item_table):
    b = users.shape[0]
    num_users, d = user_table.shape
    num_items = item_table.shape[0]

    # Explicit OOB policy: clamp (torch's nn.Embedding would raise instead).
    users = jnp.clip(users.astype(jnp.int32), 0, num_users - 1)
    items = jnp.clip(items.astype(jnp.int32), 0, num_items - 1)

    # View tables as (N, 1, D) so the gathered (1, 1, D) block has its last two dims
    # equal to the full array dims (clean TPU tiling; no sublane-divisibility issue).
    u_tab3 = user_table.reshape(num_users, 1, d)
    i_tab3 = item_table.reshape(num_items, 1, d)

    grid_spec = pltpu.PrefetchScalarGridSpec(
        num_scalar_prefetch=2,                       # users, items land in SMEM
        grid=(b,),
        in_specs=[
            pl.BlockSpec((1, 1, d), lambda i, u, it: (u[i], 0, 0)),   # user row gather
            pl.BlockSpec((1, 1, d), lambda i, u, it: (it[i], 0, 0)),  # item row gather
        ],
        out_specs=pl.BlockSpec((1, b), lambda i, u, it: (0, 0)),      # resident slab
    )

    out = pl.pallas_call(
        bpr_forward_kernel,
        out_shape=jax.ShapeDtypeStruct((1, b), jnp.float32),
        grid_spec=grid_spec,
        compiler_params=pltpu.CompilerParams(
            dimension_semantics=("arbitrary",)),     # output resident across the axis
    )(users, items, u_tab3, i_tab3)
    # TODO(synk): for very large B, tile the batch and manually double-buffer the row
    # gathers (make_async_copy) to amortize the ~0.35us/step grid overhead.
    return out[0]                                    # (B,)


# --------------------------------------------------------------------------------------
# getUsersRating: stream item-table tiles, users_emb resident, lane-dense output
# --------------------------------------------------------------------------------------
def bpr_rating_kernel(users_emb_ref, i_tile_ref, o_ref):
    """o = sigmoid(users_emb @ item_tile.T) for one streamed item-table tile.

    users_emb_ref : (B, D)   resident across the grid.
    i_tile_ref    : (TN, D)  current item-table tile (BlockSpec-pipelined from HBM).
    o_ref         : (B, TN)  lane-dense output tile (item axis on lanes).
    """
    scores = jax.lax.dot_general(
        users_emb_ref[...], i_tile_ref[...],
        dimension_numbers=(((1,), (1,)), ((), ())),  # contract on D — no transpose
        preferred_element_type=jnp.float32)
    o_ref[...] = jax.nn.sigmoid(scores)


def bpr_users_rating(users, user_table, item_table, *, item_tile=None):
    b = users.shape[0]
    num_users, d = user_table.shape
    num_items = item_table.shape[0]

    users = jnp.clip(users.astype(jnp.int32), 0, num_users - 1)
    # Small (B, D) user gather done in the wrapper (XLA gather); the kernel then only
    # streams the (potentially huge) item table.
    users_emb = jnp.take(user_table, users, axis=0)

    if item_tile is None:
        # Full table if small; otherwise 2048-row tiles (multiple of 8/128/256 ->
        # MXU-friendly on v5e/v6e/v7x; ~0.5 MiB/buffer at D=64 f32, so double
        # buffering fits comfortably even in v7x's 64 MiB VMEM).
        item_tile = num_items if num_items <= 2048 else 2048
    tn = item_tile
    grid = (pl.cdiv(num_items, tn),)

    return pl.pallas_call(
        bpr_rating_kernel,
        out_shape=jax.ShapeDtypeStruct((b, num_items), jnp.float32),
        grid=grid,
        in_specs=[
            pl.BlockSpec((b, d), lambda j: (0, 0)),    # users_emb resident
            pl.BlockSpec((tn, d), lambda j: (j, 0)),   # streamed item-table tiles
        ],
        out_specs=pl.BlockSpec((b, tn), lambda j: (0, j)),
        compiler_params=pltpu.CompilerParams(
            dimension_semantics=("parallel",),         # shard item tiles across TCs (v7x)
            vmem_limit_bytes=32 * 1024 * 1024),
    )(users_emb, item_table)


# --------------------------------------------------------------------------------------
# Module wrapper
# --------------------------------------------------------------------------------------
class BPR:
    """JAX/Pallas port of smile_main/PureMF.py::BPR (forward + getUsersRating)."""

    def __init__(self, num_users, num_items, latent_dim, key, table_dtype=jnp.float32):
        ku, ki = jax.random.split(key)
        # nn.init.normal_(..., std=0.1). Pass table_dtype=jnp.bfloat16 to halve the
        # HBM streaming bytes of getUsersRating (kernels accumulate in f32 either way).
        self.embedding_user = (0.1 * jax.random.normal(
            ku, (num_users, latent_dim), dtype=jnp.float32)).astype(table_dtype)
        self.embedding_item = (0.1 * jax.random.normal(
            ki, (num_items, latent_dim), dtype=jnp.float32)).astype(table_dtype)
        self.num_users = num_users
        self.num_items = num_items
        self.latent_dim = latent_dim

    def forward(self, users, items):
        return bpr_forward(users, items, self.embedding_user, self.embedding_item)

    def getUsersRating(self, users):
        return bpr_users_rating(users, self.embedding_user, self.embedding_item)

    # TODO(synk): cal_loss (BPR training loss) is a training-only path and is not
    # ported to Pallas here.


if __name__ == "__main__":
    key = jax.random.PRNGKey(0)
    k_model, k_u, k_i = jax.random.split(key, 3)

    num_users, num_items, latent_dim, batch = 16, 24, 32, 8
    model = BPR(num_users, num_items, latent_dim, k_model)

    users = jax.random.randint(k_u, (batch,), 0, num_users, dtype=jnp.int32)
    items = jax.random.randint(k_i, (batch,), 0, num_items, dtype=jnp.int32)

    # Pallas kernels
    scores = jax.block_until_ready(model.forward(users, items))          # (B,)
    ratings = jax.block_until_ready(model.getUsersRating(users))         # (B, num_items)

    # Pure-JAX references (torch semantics)
    u_emb_ref = jnp.take(model.embedding_user, users, axis=0).astype(jnp.float32)
    i_emb_ref = jnp.take(model.embedding_item, items, axis=0).astype(jnp.float32)
    scores_ref = jax.nn.sigmoid(jnp.sum(u_emb_ref * i_emb_ref, axis=1))
    ratings_ref = jax.nn.sigmoid(u_emb_ref @ model.embedding_item.astype(jnp.float32).T)

    assert scores.shape == (batch,) and scores.dtype == jnp.float32
    assert ratings.shape == (batch, num_items) and ratings.dtype == jnp.float32
    assert jnp.allclose(scores, scores_ref, atol=1e-5, rtol=1e-5), \
        float(jnp.max(jnp.abs(scores - scores_ref)))
    assert jnp.allclose(ratings, ratings_ref, atol=1e-5, rtol=1e-5), \
        float(jnp.max(jnp.abs(ratings - ratings_ref)))

    print("KERNEL_OK")
</pallas_src>

<mosaic_0001>
module attributes {stable_mosaic.version = 11 : i64} {
  func.func @bpr_forward_kernel(%arg0: i32, %arg1: memref<8xi32, #tpu.memory_space<smem>>, %arg2: memref<8xi32, #tpu.memory_space<smem>>, %arg3: memref<1x1x32xf32, #tpu.memory_space<vmem>>, %arg4: memref<1x1x32xf32, #tpu.memory_space<vmem>>, %arg5: memref<1x8xf32, #tpu.memory_space<vmem>>) attributes {dimension_semantics = [#tpu.dimension_semantics<arbitrary>], iteration_bounds = array<i64: 8>, scalar_prefetch = 2 : i64, scratch_operands = 0 : i64, tpu.core_type = #tpu.core_type<tc>, window_params = [{transform_indices = @transform_0, window_bounds = array<i64: 1, 1, 32>}, {transform_indices = @transform_1, window_bounds = array<i64: 1, 1, 32>}, {pipeline_mode = #tpu.pipeline_mode<synchronous>, transform_indices = @transform_2, window_bounds = array<i64: 1, 8>}]} {
    %c0_i32 = arith.constant 0 : i32
    %0 = arith.cmpi eq, %arg0, %c0_i32 : i32
    %1 = arith.extui %0 : i1 to i32
    %c0_i32_0 = arith.constant 0 : i32
    %2 = arith.cmpi ne, %1, %c0_i32_0 : i32
    scf.if %2 {
      %cst_11 = arith.constant 0.000000e+00 : f32
      %21 = vector.broadcast %cst_11 : f32 to vector<1x8xf32>
      %c0_12 = arith.constant 0 : index
      %c0_13 = arith.constant 0 : index
      %22 = vector.load %arg5[%c0_12, %c0_13] : memref<1x8xf32, #tpu.memory_space<vmem>>, vector<1x8xf32>
      tpu.vector_store %arg5[%c0_12, %c0_13], %21 {strides = array<i32>} : memref<1x8xf32, #tpu.memory_space<vmem>>, vector<1x8xf32>,
    } else {
    }
    %c0 = arith.constant 0 : index
    %c0_1 = arith.constant 0 : index
    %c0_2 = arith.constant 0 : index
    %3 = vector.load %arg3[%c0, %c0_1, %c0_2] : memref<1x1x32xf32, #tpu.memory_space<vmem>>, vector<1x1x32xf32>
    %c0_3 = arith.constant 0 : index
    %c0_4 = arith.constant 0 : index
    %c0_5 = arith.constant 0 : index
    %4 = vector.load %arg4[%c0_3, %c0_4, %c0_5] : memref<1x1x32xf32, #tpu.memory_space<vmem>>, vector<1x1x32xf32>
    %5 = arith.mulf %3, %4 : vector<1x1x32xf32>
    %6 = vector.shape_cast %5 : vector<1x1x32xf32> to vector<1x1x1x32xf32>
    %cst = arith.constant dense<0.000000e+00> : vector<1xf32>
    %7 = vector.multi_reduction <add>, %6, %cst [1, 2, 3] : vector<1x1x1x32xf32> to vector<1xf32>
    %8 = vector.shape_cast %7 : vector<1xf32> to vector<1x1x1x1xf32>
    %9 = vector.extract %8[0, 0, 0, 0] : f32 from vector<1x1x1x1xf32>
    %10 = arith.negf %9 : f32
    %11 = math.exp %10 : f32
    %cst_6 = arith.constant 1.000000e+00 : f32
    %12 = arith.addf %cst_6, %11 : f32
    %13 = arith.divf %cst_6, %12 : f32
    %14 = tpu.iota {dimensions = array<i32: 1>} : vector<1x8xi32>
    %15 = vector.broadcast %arg0 : i32 to vector<1x8xi32>
    %16 = arith.cmpi eq, %14, %15 : vector<1x8xi32>
    %c0_7 = arith.constant 0 : index
    %c0_8 = arith.constant 0 : index
    %17 = vector.load %arg5[%c0_7, %c0_8] : memref<1x8xf32, #tpu.memory_space<vmem>>, vector<1x8xf32>
    %18 = vector.broadcast %13 : f32 to vector<1x8xf32>
    %19 = arith.select %16, %18, %17 : vector<1x8xi1>, vector<1x8xf32>
    %c0_9 = arith.constant 0 : index
    %c0_10 = arith.constant 0 : index
    %20 = vector.load %arg5[%c0_9, %c0_10] : memref<1x8xf32, #tpu.memory_space<vmem>>, vector<1x8xf32>
    tpu.vector_store %arg5[%c0_9, %c0_10], %19 {strides = array<i32>} : memref<1x8xf32, #tpu.memory_space<vmem>>, vector<1x8xf32>,
    return
  }
  func.func @transform_0(%arg0: i32, %arg1: memref<8xi32, #tpu.memory_space<smem>>, %arg2: memref<8xi32, #tpu.memory_space<smem>>) -> (i32, i32, i32) {
    %0 = arith.index_cast %arg0 : i32 to index
    %1 = memref.load %arg1[%0] : memref<8xi32, #tpu.memory_space<smem>>
    %c0_i32 = arith.constant 0 : i32
    %c0_i32_0 = arith.constant 0 : i32
    %c0_i32_1 = arith.constant 0 : i32
    return %1, %c0_i32, %c0_i32_0 : i32, i32, i32
  }
  func.func @transform_1(%arg0: i32, %arg1: memref<8xi32, #tpu.memory_space<smem>>, %arg2: memref<8xi32, #tpu.memory_space<smem>>) -> (i32, i32, i32) {
    %0 = arith.index_cast %arg0 : i32 to index
    %1 = memref.load %arg2[%0] : memref<8xi32, #tpu.memory_space<smem>>
    %c0_i32 = arith.constant 0 : i32
    %c0_i32_0 = arith.constant 0 : i32
    %c0_i32_1 = arith.constant 0 : i32
    return %1, %c0_i32, %c0_i32_0 : i32, i32, i32
  }
  func.func @transform_2(%arg0: i32, %arg1: memref<8xi32, #tpu.memory_space<smem>>, %arg2: memref<8xi32, #tpu.memory_space<smem>>) -> (i32, i32) {
    %c0_i32 = arith.constant 0 : i32
    %c0_i32_0 = arith.constant 0 : i32
    %c0_i32_1 = arith.constant 0 : i32
    return %c0_i32, %c0_i32_0 : i32, i32
  }
}

</mosaic_0001>

<bundles_post_ra>
// kernel: tpu_custom_call.1
= control target key start
LH: loop header
LB: loop body
LE: loop exit
PB: predicated region body
PF: predicated region fallthrough
CT: control target
= control target key end

     0   :  { %s615_s21 = smov [#allocation3]   ;;  %s616_s22 = smov [#allocation4]   ;;  %s839_s0 = inlined_call_operand.hbm [shape: s32[8], index: 0, kind: input, shape index: {}]   ;;  %s840_s2 = inlined_call_operand.hbm [shape: f32[16,1,32], index: 2, kind: input, shape index: {}]   ;;  %s841_s3 = inlined_call_operand.hbm [shape: f32[24,1,32], index: 3, kind: input, shape index: {}]   ;;  %s842_s4 = inlined_call_operand.hbm [shape: f32[1,8], index: 4, kind: output, shape index: {}]   ;;  %s843_s1 = inlined_call_operand.hbm [shape: s32[8], index: 1, kind: input, shape index: {}]  }
   0x1   :  { %s10_s17 = sshll.u32 %s839_s0, 4  ;;  %s15_s20 = sshll.u32 %s843_s1, 4  ;;  %s11_s17 = int_to_ptr.hbm [resolvable:$true] %s10_s17  ;;  %s16_s20 = int_to_ptr.hbm [resolvable:$true] %s15_s20 }
   0x2   :  { %13 = dma.hbm_to_smem %s11_s17, 16, %s615_s21, [#allocation2] }
   0x3   :  { %18 = dma.hbm_to_smem %s16_s20, 16, %s616_s22, [#allocation2] }
   0x4   :  { %573 = dma.done.wait [#allocation2], 32 }
   0x5   :  { %574 = vsyncadd [#allocation2], 4294967264 }
   0x6   :  { %21 = sfence }
   0x7   :  { %22 = vsyncpa [#allocation6], 0 }
   0x8   :  { %24 = vsyncpa [#allocation6 + $0x1], 0 }
   0x9   :  { %25 = vsyncpa [#allocation9], 0 }
   0xa   :  { %27 = vsyncpa [#allocation9 + $0x1], 0 }
   0xb   :  { %28 = vsyncpa [#allocation7], 0  ;;  %s650_s23 = smov 0   ;;  %s652_s0 = smov 0  }
   0xc   :  { %s654_s24 = smov 0   ;;  %s656_s1 = smov 0  }
   0xd   :  { %s658_s25 = smov 0   ;;  %s660_s26 = smov 0  }
   0xe   :  { %s662_s27 = smov 0  }
   0xf LB: > { %s684_s28 = sadd.s32 1, %s613_s27   ;;  %s687_s29 = sadd.s32 4294967295, %s613_s27   ;;  %s613_s27 = sphi %s662_s27, %s861_s27   ;;  %s609_s26 = sphi %s660_s26, %s860_s26   ;;  %s605_s25 = sphi %s658_s25, %s859_s25   ;;  %s601_s1 = sphi %s656_s1, %s858_s1   ;;  %s597_s24 = sphi %s654_s24, %s857_s24   ;;  %s593_s0 = sphi %s652_s0, %s856_s0   ;;  %s589_s23 = sphi %s650_s23, %s855_s23  }
  0x10   : > { %s38_s30 = sld [smem:[#allocation3 + %s613_s27]]  ;;  %p50_p0 = scmp.ne.s32.totalorder %s609_s26, %s605_s25 }
  0x11   : > { %s39_s5 = sld [smem:[#allocation3 + %s684_s28]]  ;;  %p51_p1 = scmp.eq.s32.totalorder %s613_s27, 0 }
  0x12   : > { %p56_p2 = scmp.ne.s32.totalorder %s605_s25, %s601_s1  ;;  %p57_p3 = scmp.eq.s32.totalorder %s687_s29, 0 }
  0x13   : > { %s43_s6 = sadd.s32 1, %s609_s26  ;;  %p699_p4 = por %p51_p1, %p50_p0 }
  0x14   : > { %p705_p5 = por %p57_p3, %p56_p2  ;;  %s129_s9 = sand.u32 1, %s609_s26  }
  0x15   : > { %p844_p6 = scmp.lt.s32.totalorder %s613_s27, 8  ;;  %s132_s11 = scalar_lea.vmem [#allocation5], %s129_s9 }
  0x16   : > { %s140_s12 = sshll.u32 %s132_s11, 4  ;;  %p331_p9 = scmp.ge.s32.totalorder %s613_s27, 1  ;;  %s141_s12 = int_to_ptr.vmem [resolvable:$true] %s140_s12 }
  0x17   : > { %s40_s10 = ssub.s32 %s38_s30, %s39_s5  ;;  %p727_p8 = pnand %p844_p6, %p699_p4 }
  0x18   : > { %p41_p7 = scmp.eq.s32.totalorder %s40_s10, 0  ;;  %p163_p10 = scmp.lt.s32.totalorder %s613_s27, 9 }
  0x19   : > { %s343_s13 = scalar_select %p699_p4, [#allocation3], [#allocation11] }
  0x1a   : > { %s714_s14 = scalar_select %p41_p7, %s609_s26, %s43_s6  }
  0x1b   : > { %s344_s15 = scalar_select %p699_p4, %s613_s27, 0 }
  0x1c   : > { %s863_s13 = smov (!%p844_p6, %s343_s13), [#allocation13]  ;;  %p733_p11 = pnand %p331_p9, %p163_p10 }
  0x1d   : > { %s865_s15 = smov (!%p844_p6, %s344_s15), 0  ;;  %s66_s19 = sld [smem:[#allocation4 + %s613_s27]] }
  0x1e   : > { %s133_s17 = sld [smem:[%s863_s13 + %s865_s15]]  ;;  %p78_p12 = scmp.ne.s32.totalorder %s597_s24, %s593_s0 }
  0x1f   : > { %s67_s1 = sld [smem:[#allocation4 + %s684_s28]]  ;;  %s130_s5 = scalar_lea.sflag [#allocation6], %s129_s9 }
  0x20   : > { %p461_p2 = pneg %p727_p8  ;;  %s464_s13 = scalar_lea.hbm %s840_s2, 16 }
  0x24   : > { %s136_s22 = scalar_lea.hbm %s840_s2, %s133_s17 }
  0x25   : > { %s138_s30 = sshll.u32 %s136_s22, 4  ;;  %s139_s30 = int_to_ptr.hbm [resolvable:$true] %s138_s30 }
  0x26   : > { %s457_s6 = sshra.s32 %s139_s30, 4  ;;  %s458_s6 = int_to_ptr.hbm [resolvable:$true] %s457_s6 }
  0x27   : > { %s459_s7 = scalar_lea.hbm %s458_s6, 1  ;;  %p465_p9 = scmp.lt.s32.totalorder %s458_s6, %s840_s2 }
  0x28   : > { %p460_p0 = scmp.ne.s32.totalorder %s458_s6, %s459_s7  ;;  %p466_p10 = scmp.lt.s32.totalorder %s464_s13, %s459_s7 }
  0x2a   : > { %p462_p4 = pnand %p461_p2, %p460_p0  ;;  %p467_p6 = por %p466_p10, %p465_p9 }
  0x2c   : > { %p463_p7 = pneg %p462_p4 }
  0x2e   : > { %p468_p13 = pnand %p467_p6, %p463_p7 }
  0x30   : > { %471 = shalt.err (!%p468_p13)
}
  0x31   : > { %360 = dma.hbm_to_vmem [thread:$0]  (!%p727_p8), %s139_s30, 16, %s141_s12, %s130_s5  }
  0x32   : > { %p80_p6 = por %p78_p12, %p51_p1  ;;  %p849_p13 = scmp.ne.s32.totalorder %s593_s0, %s589_s23 }
  0x33   : > { %s68_s16 = ssub.s32 %s66_s19, %s67_s1  ;;  %s71_s20 = sadd.s32 1, %s597_s24 }
  0x34   : > { %p766_p0 = por %p849_p13, %p57_p3  ;;  %p69_p2 = scmp.eq.s32.totalorder %s68_s16, 0 }
  0x35   : > { %s147_s21 = sand.u32 1, %s597_s24   ;;  %p851_p4 = scmp.lt.s32.totalorder %s613_s27, 8 }
  0x36   : > { %s346_s22 = scalar_select %p80_p6, [#allocation4], [#allocation12] }
  0x37   : > { %s773_s6 = scalar_select %p69_p2, %s597_s24, %s71_s20  }
  0x38   : > { %s347_s7 = scalar_select %p80_p6, %s613_s27, 0 }
  0x39   : > { %s867_s22 = smov (!%p851_p4, %s346_s22), [#allocation14]  ;;  %p852_p8 = pmov %p851_p4 }
  0x3a   : > { %p853_p7 = pmov %p851_p4  ;;  %s150_s30 = scalar_lea.vmem [#allocation8], %s147_s21 }
  0x3b   : > { %s869_s7 = smov (!%p852_p8, %s347_s7), 0  ;;  %s158_s19 = sshll.u32 %s150_s30, 4  ;;  %s159_s19 = int_to_ptr.vmem [resolvable:$true] %s158_s19 }
  0x3c   : > { %p782_p1 = pnand %p853_p7, %p80_p6  ;;  %s151_s23 = sld [smem:[%s867_s22 + %s869_s7]] }
  0x3d   : > { %s148_s13 = scalar_lea.sflag [#allocation9], %s147_s21  ;;  %s494_s20 = scalar_lea.hbm %s841_s3, 24 }
  0x3e   : > { %p491_p12 = pneg %p782_p1 }
  0x42   : > { %s154_s10 = scalar_lea.hbm %s841_s3, %s151_s23 }
  0x43   : > { %s156_s11 = sshll.u32 %s154_s10, 4  ;;  %s157_s11 = int_to_ptr.hbm [resolvable:$true] %s156_s11 }
  0x44   : > { %s487_s15 = sshra.s32 %s157_s11, 4  ;;  %s488_s15 = int_to_ptr.hbm [resolvable:$true] %s487_s15 }
  0x45   : > { %s489_s17 = scalar_lea.hbm %s488_s15, 1  ;;  %p495_p6 = scmp.lt.s32.totalorder %s488_s15, %s841_s3 }
  0x46   : > { %p490_p3 = scmp.ne.s32.totalorder %s488_s15, %s489_s17  ;;  %p496_p13 = scmp.lt.s32.totalorder %s494_s20, %s489_s17 }
  0x48   : > { %p492_p9 = pnand %p491_p12, %p490_p3  ;;  %p497_p2 = por %p496_p13, %p495_p6 }
  0x4a   : > { %p493_p10 = pneg %p492_p9 }
  0x4c   : > { %p498_p4 = pnand %p497_p2, %p493_p10 }
  0x4e   : > { %501 = shalt.err (!%p498_p4)
}
  0x4f   : > { %365 = dma.hbm_to_vmem [thread:$0]  (!%p782_p1), %s157_s11, 16, %s159_s19, %s148_s13  }
  0x50   : > { %167 = sbr.rel (%p733_p11) target bundleno = 418 (0x1a2), region = 28  ;;  %s169_s21 = sand.u32 (!%p733_p11), 1, %s605_s25  }
  0x51   : > { %s170_s23 = scalar_lea.sflag (!%p733_p11), [#allocation6], %s169_s21  ;;  %s172_s30 = scalar_lea.vmem (!%p733_p11), [#allocation5], %s169_s21 }
  0x55   : > { %576 = dma.done.wait (%p705_p5), %s170_s23, 16  }
  0x56   : > { %578 = vsyncadd (%p705_p5), %s170_s23, 4294967280  ;;  %s178_s1 = sand.u32 1, %s593_s0  }
  0x57   : > { %s179_s5 = scalar_lea.sflag [#allocation9], %s178_s1  ;;  %s181_s10 = scalar_lea.vmem [#allocation8], %s178_s1 }
  0x58   : > { %580 = dma.done.wait (%p766_p0), %s179_s5, 16  }
  0x59   : > { %582 = vsyncadd (%p766_p0), %s179_s5, 4294967280  ;;  %p332_p11 = scmp.ne.s32.totalorder %s687_s29, 0 }
  0x5b   : > { %206 = sbr.rel (%p332_p11) target bundleno = 98 (0x62), region = 40 }
  0x60   : > { %vm207_vm0 = vcmask 57344   ;;  %v617_v0 = vmov 0.0  }
  0x61   : > { %208 = vst.msk [vmem:[#allocation10] sm:$0x1] %vm207_vm0, %v617_v0 }
  0x62 PF: > { %v209_v1 = vld [vmem:[%s172_s30] sm:$0x1]  ;;  %vm212_vm1 = vcmask 253952   ;;  %v245_v26 = vlaneseq  ;;  %v247_v28 = vstv %s687_s29  ;;  %s618_s19 = smov [#allocation10]   ;;  %s262_s17 = sshll.u32 %s842_s4, 4  ;;  %vm252_vm7 = vcmask 57344   ;;  %s263_s17 = int_to_ptr.hbm [resolvable:$true] %s262_s17 }
  0x63   : > { %v210_v2 = vld [vmem:[%s181_s10] sm:$0x1]  ;;  %s260_s11 = sshll.u32 %s618_s19, 4  ;;  %p367_p5 = scmp.eq.s32.totalorder %s687_s29, 7  ;;  %s261_s11 = int_to_ptr.vmem [resolvable:$true] %s260_s11 }
  0x64   : > { %v211_v3 = vmul.f32 %v210_v2, %v209_v1  ;;  %v246_v27 = vand.u32 127, %v245_v26 }
  0x66   : > { %v213_v4 = vsel %vm212_vm1, %v211_v3, 0.0  ;;  %vm248_vm6 = vcmp.eq.s32.totalorder %v246_v27, %v247_v28 }
  0x67   : > { %214 = vadd.xlane.f32.xlu0 %v213_v4 }
  0x68   : > { %v249_v29 = vld [vmem:[#allocation10] sm:$0x1] }
  0xda   : > { %v215_v5 = vpop.xlane.xlu0 %214 }
  0xdb   : > { %v216_v6 = vrot.slane %v215_v5, 4 }
  0xdd   : > { %v217_v7 = vadd.f32 %v216_v6, %v215_v5 }
  0xdf   : > { %v218_v8 = vrot.slane %v217_v7, 2 }
  0xe1   : > { %v219_v9 = vadd.f32 %v218_v8, %v217_v7 }
  0xe3   : > { %v220_v10 = vrot.slane %v219_v9, 1 }
  0xe5   : > { %v221_v11 = vadd.f32 %v220_v10, %v219_v9 }
  0xe7   : > { %337 = vpush %v221_v11 }
 0x118   : > { %s338_s8 = spop %337 }
 0x119   : > { %s223_s18 = sxor.u32 2147483648, %s338_s8 }
 0x11a   : > { %v224_v12 = vstv %s223_s18 }
 0x11b   : > { %v225_v13 = vmul.f32 1.442695, %v224_v12 }
 0x11d   : > { %429 = vpow2.f32 %v225_v13 }
 0x123   : > { %v430_v14 = vpop.eup %429 }
 0x124   : > { %339 = vpush %v430_v14 }
 0x155   : > { %s340_s9 = spop %339 }
 0x156   : > { %s228_s12 = sadd.f32 1.0, %s340_s9 }
 0x158   : > { %v229_v15 = vstv %s228_s12 }
 0x159   : > { %431 = vrcp.f32 %v229_v15  ;;  %v241_v19 = vand.u32 2147483648, %v229_v15  ;;  %v239_v21 = vand.u32 2147483647, %v229_v15  ;;  %vm235_vm3 = vweird.f32 %v229_v15 }
 0x15b   : > { %v242_v23 = vor.u32 1.1754944e-38, %v241_v19  ;;  %vm240_vm5 = vcmp.eq.f32.partialorder %v239_v21, 8.507059e+37 }
 0x15f   : > { %v432_v16 = vpop.eup %431 }
 0x160   : > { %v231_v17 = vmul.f32 %v432_v16, %v229_v15  ;;  %vm236_vm2 = vweird.f32 %v432_v16 }
 0x161   : > { %vm237_vm4 = vmor %vm235_vm3, %vm236_vm2 }
 0x162   : > { %v232_v18 = vsub.f32 1.0, %v231_v17 }
 0x164   : > { %v233_v20 = vmul.f32 %v432_v16, %v232_v18 }
 0x166   : > { %v234_v22 = vadd.f32 %v432_v16, %v233_v20 }
 0x168   : > { %v238_v24 = vsel %vm237_vm4, %v432_v16, %v234_v22 }
 0x169   : > { %v243_v25 = vsel %vm240_vm5, %v242_v23, %v238_v24 }
 0x16a   : > { %341 = vpush %v243_v25 }
 0x19b   : > { %s342_s27 = spop %341 }
 0x19c   : > { %v250_v30 = vstv %s342_s27 }
 0x19d   : > { %v251_v31 = vsel %vm248_vm6, %v250_v30, %v249_v29 }
 0x19e   : > { %253 = vst.msk [vmem:[#allocation10] sm:$0x1] %vm252_vm7, %v251_v31 }
 0x19f   : > { %352 = dma.vmem_to_hbm [thread:$0]  (%p367_p5), %s261_s11, 16, %s263_s17, [#allocation7]  }
 0x1a0   : > { %584 = dma.done.wait (%p367_p5), [#allocation7], 16  }
 0x1a1   : > { %586 = vsyncadd (%p367_p5), [#allocation7], 4294967280 }
 0x1a2 PF: > { %p31_p0 = scmp.ge.s32.totalorder %s684_s28, 10   ;;  %s855_s23 = smov %s593_s0 }
 0x1a3   : > { %s856_s0 = smov %s597_s24  ;;  %s857_s24 = smov %s773_s6 }
 0x1a4   : > { %s858_s1 = smov %s605_s25  ;;  %s859_s25 = smov %s609_s26 }
 0x1a5   : > { %s860_s26 = smov %s714_s14  ;;  %s861_s27 = smov %s684_s28 }
 0x1a6   :  { %33 = sbr.rel (!%p31_p0) target bundleno = 15 (0xf), region = 82 }
 0x1ab   :  { %276 = vsyncpa [#allocation6], 1 }
 0x1ac   :  { %278 = vsyncpa [#allocation6 + $0x1], 1 }
 0x1ad   :  { %279 = vsyncpa [#allocation9], 1 }
 0x1ae   :  { %281 = vsyncpa [#allocation9 + $0x1], 1 }
 0x1af   :  { %282 = vsyncpa [#allocation7], 1 }
 0x1b0   :  { %284 = vsyncpa [#allocation7 + $0x1], 1 }

</bundles_post_ra>
